<compile_context>
chip_gen: v7x
topology: tpu7x:2x2x1
jax: 0.10.0
libtpu: 0.0.40
codegen_flags: <defaults>
</compile_context>

<pallas_src>
import functools

import jax
import jax.numpy as jnp
from jax import lax
from jax.experimental import pallas as pl
from jax.experimental.pallas import tpu as pltpu


# ----------------------------------------------------------------------------
# helpers
# ----------------------------------------------------------------------------

def _round_up(x, m):
    return ((x + m - 1) // m) * m


def _vmem_cap_bytes():
    """Physical per-core VMEM; falls back to the v7x-safe 64 MiB."""
    try:
        return int(pltpu.get_tpu_info().vmem_capacity_bytes)
    except Exception:
        return 64 * 2 ** 20


def _vmem_limit(bytes_needed):
    # 2x headroom on the computed requirement, clamped to ~85% of the
    # generation's physical VMEM (128 MiB on v5e/v6e, 64 MiB on v7x).
    ceiling = (_vmem_cap_bytes() * 85) // 100
    return int(min(ceiling, max(16 * 2 ** 20, 2 * bytes_needed)))


_SQRT_HALF = 0.7071067811865476


def _erf(x):
    # Abramowitz & Stegun 7.1.26 rational approximation, |err| <= 1.5e-7.
    # Mosaic has no erf primitive, so the exact nn.GELU() is built from
    # exp + basic VPU ops.
    a1, a2, a3, a4, a5 = (0.254829592, -0.284496736, 1.421413741,
                          -1.453152027, 1.061405429)
    p = 0.3275911
    ax = jnp.abs(x)
    t = 1.0 / (1.0 + p * ax)
    poly = ((((a5 * t + a4) * t + a3) * t + a2) * t + a1) * t
    y = 1.0 - poly * jnp.exp(-ax * ax)
    return jnp.where(x >= 0, y, -y)


def _gelu_exact(x):
    return 0.5 * x * (1.0 + _erf(x * _SQRT_HALF))


# ----------------------------------------------------------------------------
# Pallas kernels
# ----------------------------------------------------------------------------

def linear_kernel(x_ref, w_ref, b_ref, o_ref):
    """y = x @ w + b.  `w` arrives pre-transposed (in, out) and bf16; the f32
    activation tile is cast to bf16 in-kernel (VPU filler hidden under the MXU)
    and accumulated in f32."""
    y = jnp.dot(x_ref[...].astype(jnp.bfloat16), w_ref[...],
                preferred_element_type=jnp.float32)
    o_ref[...] = (y + b_ref[0]).astype(o_ref.dtype)


def linear(x, w_t, b2d, *, tm=256):
    """Row-tiled linear layer.  x:(M,K) f32, w_t:(K,O) bf16, b2d:(1,O) f32.
    No wrapper-side cast/pad: partial edge tiles are handled by Pallas OOB
    masking (each output row only depends on its own input row)."""
    M, K = x.shape
    O = w_t.shape[1]
    tm_eff = M if M <= tm else tm            # tm multiple of 8; M-block is legal
    grid_m = pl.cdiv(M, tm_eff)
    need = 2 * (tm_eff * K * 4 + tm_eff * O * 4 + K * O * 2 + O * 4) \
        + tm_eff * max(K, O) * 4
    # TODO(synk): on v7x, pipeline_mode=pl.Buffered(1) on the constant weight
    # spec halves its VMEM footprint (it never changes across grid steps).
    return pl.pallas_call(
        linear_kernel,
        out_shape=jax.ShapeDtypeStruct((M, O), jnp.float32),
        grid=(grid_m,),
        in_specs=[pl.BlockSpec((tm_eff, K), lambda i: (i, 0)),
                  pl.BlockSpec((K, O), lambda i: (0, 0)),
                  pl.BlockSpec((1, O), lambda i: (0, 0))],
        out_specs=pl.BlockSpec((tm_eff, O), lambda i: (i, 0)),
        compiler_params=pltpu.CompilerParams(
            dimension_semantics=("parallel",),
            vmem_limit_bytes=_vmem_limit(need)),
    )(x, w_t, b2d)


def fused_block_kernel(x_ref, ln1w_ref, ln1b_ref, qkvw_ref, qkvb_ref,
                       projw_ref, projb_ref, ln2w_ref, ln2b_ref,
                       fc1w_ref, fc1b_ref, fc2w_ref, fc2b_ref,
                       o_ref, *, n_heads, n_real):
    """Grid = (batch, depth).  One invocation applies transformer block `d` to
    image `b`:  x += Attn(LN1(x));  x += MLP(LN2(x)).

    The residual stream lives in the output block, which is resident in VMEM
    across the whole depth axis (output block index depends only on b).  All
    matmuls take bf16 operands (weights pre-transposed to (in,out)) with f32
    MXU accumulation; elementwise math stays f32.
    """
    d = pl.program_id(1)

    @pl.when(d == 0)
    def _():
        o_ref[0] = x_ref[0]                    # initialize the residual stream

    x = o_ref[0]                               # (Np, D) f32
    Np, D = x.shape
    hd = D // n_heads
    scale = float(hd) ** -0.5

    def layernorm(v, w_ref, b_ref):
        mu = jnp.mean(v, axis=-1, keepdims=True)
        var = jnp.mean(jnp.square(v - mu), axis=-1, keepdims=True)  # biased, like torch
        return (v - mu) * lax.rsqrt(var + 1e-6) * w_ref[0] + b_ref[0]

    # ----- multi-head self attention -----
    h = layernorm(x, ln1w_ref, ln1b_ref)
    qkv = jnp.dot(h.astype(jnp.bfloat16), qkvw_ref[0],
                  preferred_element_type=jnp.float32) + qkvb_ref[0]  # (Np, 3D)
    qb = (qkv[:, :D] * scale).astype(jnp.bfloat16)   # fold softmax scale into q
    kb = qkv[:, D:2 * D].astype(jnp.bfloat16)
    vb = qkv[:, 2 * D:].astype(jnp.bfloat16)
    projw = projw_ref[0]                             # (D, D) bf16

    # mask padded key tokens (hoisted out of the head loop)
    if n_real < Np:
        key_id = lax.broadcasted_iota(jnp.int32, (Np, Np), 1)
        score_bias = jnp.where(key_id < n_real, 0.0, -1e30).astype(jnp.float32)
    else:
        score_bias = None

    attn_out = jnp.zeros((Np, D), jnp.float32)
    # TODO(synk): pack 2 heads (v5e) / 4 heads (v6e/v7x) per score & PV matmul
    # via a block-diagonal K/V layout so the contraction width per MXU pass is
    # >=128/256; per-head hd-wide contraction under-utilizes MXU columns.
    for hh in range(n_heads):                        # static unroll over heads
        lo = hh * hd
        # q_h @ k_h^T without materializing a transpose: contract dim1 vs dim1.
        s = lax.dot_general(qb[:, lo:lo + hd], kb[:, lo:lo + hd],
                            dimension_numbers=(((1,), (1,)), ((), ())),
                            preferred_element_type=jnp.float32)       # (Np, Np)
        if score_bias is not None:
            s = s + score_bias
        m = jnp.max(s, axis=-1, keepdims=True)
        e = jnp.exp(s - m)
        p = e * pl.reciprocal(jnp.sum(e, axis=-1, keepdims=True), approx=True)
        o_h = jnp.dot(p.astype(jnp.bfloat16), vb[:, lo:lo + hd],
                      preferred_element_type=jnp.float32)             # (Np, hd)
        # project each head immediately and accumulate in f32: no sub-128-lane
        # scratch stores and no VMEM round-trip through a concatenated buffer.
        attn_out = attn_out + jnp.dot(o_h.astype(jnp.bfloat16),
                                      projw[lo:lo + hd, :],
                                      preferred_element_type=jnp.float32)
    x = x + attn_out + projb_ref[0]

    # ----- MLP -----
    h2 = layernorm(x, ln2w_ref, ln2b_ref)
    h2 = jnp.dot(h2.astype(jnp.bfloat16), fc1w_ref[0],
                 preferred_element_type=jnp.float32) + fc1b_ref[0]
    h2 = _gelu_exact(h2)                             # exact GELU (erf), matches nn.GELU()
    h2 = jnp.dot(h2.astype(jnp.bfloat16), fc2w_ref[0],
                 preferred_element_type=jnp.float32) + fc2b_ref[0]
    o_ref[0] = (x + h2).astype(o_ref.dtype)


def run_blocks(x, blocks, *, n_heads, n_real, depth):
    """Apply all `depth` transformer blocks in ONE pallas_call.

    grid = (B, depth): batch is "parallel" (shards across the 2 TensorCores on
    v7x when B >= 2), depth is "arbitrary" innermost so block-(d+1) weights are
    prefetched by the pipeline while block d computes and the residual stays
    resident in VMEM (written back to HBM once per image)."""
    if depth == 0:
        return x
    B, Np, D = x.shape
    names = ("ln1_w", "ln1_b", "qkv_w_t", "qkv_b", "proj_w_t", "proj_b",
             "ln2_w", "ln2_b", "fc1_w_t", "fc1_b", "fc2_w_t", "fc2_b")
    args = [blocks[n] for n in names]                # each stacked: (depth, r, c)
    weight_specs = [pl.BlockSpec((1,) + tuple(a.shape[1:]),
                                 lambda b, d: (d, 0, 0))
                    for a in args]

    hidden = blocks["fc1_w_t"].shape[-1]
    w_bytes = sum((int(a.size) // depth) * a.dtype.itemsize for a in args)
    act_bytes = Np * D * 4
    interm_bytes = 3 * Np * max(3 * D, hidden) * 4 + 2 * Np * Np * 4
    need = 2 * w_bytes + 4 * act_bytes + interm_bytes

    # TODO(synk): on v7x (64 MiB VMEM) consider fp8 weights for the MLP/qkv/proj
    # matmuls (2x MXU throughput) once validated against the f32 reference.
    return pl.pallas_call(
        functools.partial(fused_block_kernel, n_heads=n_heads, n_real=n_real),
        out_shape=jax.ShapeDtypeStruct((B, Np, D), jnp.float32),
        grid=(B, depth),
        in_specs=[pl.BlockSpec((1, Np, D), lambda b, d: (b, 0, 0))] + weight_specs,
        out_specs=pl.BlockSpec((1, Np, D), lambda b, d: (b, 0, 0)),
        compiler_params=pltpu.CompilerParams(
            dimension_semantics=("parallel", "arbitrary"),
            vmem_limit_bytes=_vmem_limit(need)),
    )(x, *args)


# ----------------------------------------------------------------------------
# Parameters & glue
# ----------------------------------------------------------------------------

def init_params(key, *, img_size, patch_size, in_chans, n_classes,
                embed_dim, depth, mlp_ratio):
    """PyTorch-convention f32 parameters (weights are (out, in))."""
    hidden = int(embed_dim * mlp_ratio)
    n_patches = (img_size // patch_size) ** 2
    K = in_chans * patch_size * patch_size
    keys = jax.random.split(key, 4 + depth)

    def w(k, shape, scale=0.02):
        return scale * jax.random.normal(k, shape, jnp.float32)

    params = {
        # conv weight (D, C, p, p) stored pre-flattened as (D, C*p*p)
        "patch_w": w(keys[0], (embed_dim, K)),
        "patch_b": w(keys[1], (embed_dim,)),
        "cls_token": jnp.zeros((1, 1, embed_dim), jnp.float32),       # torch.zeros
        # pos_emb exists in __init__ but is never used by the reference forward()
        "pos_emb": jnp.zeros((1, 1 + n_patches, embed_dim), jnp.float32),
        "head_w": w(keys[2], (n_classes, embed_dim)),
        "head_b": w(keys[3], (n_classes,)),
        "blocks": [],
    }
    for d in range(depth):
        bk = jax.random.split(keys[4 + d], 6)
        params["blocks"].append({
            "ln1_w": jnp.ones((embed_dim,), jnp.float32),
            "ln1_b": jnp.zeros((embed_dim,), jnp.float32),
            "qkv_w": w(bk[0], (3 * embed_dim, embed_dim)),
            "qkv_b": w(bk[1], (3 * embed_dim,)),
            "proj_w": w(bk[2], (embed_dim, embed_dim)),
            "proj_b": w(bk[3], (embed_dim,)),
            "ln2_w": jnp.ones((embed_dim,), jnp.float32),
            "ln2_b": jnp.zeros((embed_dim,), jnp.float32),
            "fc1_w": w(bk[4], (hidden, embed_dim)),
            "fc1_b": jnp.zeros((hidden,), jnp.float32),
            "fc2_w": w(bk[5], (embed_dim, hidden)),
            "fc2_b": jnp.zeros((embed_dim,), jnp.float32),
        })
    return params


def prepare_kernel_params(params):
    """Kernel-friendly packing done once on the host:
       * weights transposed to (in,out) and cast to bf16,
       * per-block params stacked along a leading depth axis (fused depth grid),
       * biases / LN params as (1, dim) f32,
       * head output padded to 128 lanes for lane-dense stores."""
    D = params["patch_w"].shape[0]
    n_classes = params["head_w"].shape[0]
    depth = len(params["blocks"])
    ncls_pad = _round_up(n_classes, 128)
    head_w_t = jnp.zeros((D, ncls_pad), jnp.bfloat16)
    head_w_t = head_w_t.at[:, :n_classes].set(params["head_w"].T.astype(jnp.bfloat16))
    head_b = jnp.zeros((1, ncls_pad), jnp.float32).at[0, :n_classes].set(params["head_b"])

    def stack(name, f):
        return jnp.stack([f(bp[name]) for bp in params["blocks"]], axis=0)

    blocks = {
        "ln1_w": stack("ln1_w", lambda a: a.reshape(1, -1)),
        "ln1_b": stack("ln1_b", lambda a: a.reshape(1, -1)),
        "qkv_w_t": stack("qkv_w", lambda a: a.T.astype(jnp.bfloat16)),   # (D, 3D)
        "qkv_b": stack("qkv_b", lambda a: a.reshape(1, -1)),
        "proj_w_t": stack("proj_w", lambda a: a.T.astype(jnp.bfloat16)),  # (D, D)
        "proj_b": stack("proj_b", lambda a: a.reshape(1, -1)),
        "ln2_w": stack("ln2_w", lambda a: a.reshape(1, -1)),
        "ln2_b": stack("ln2_b", lambda a: a.reshape(1, -1)),
        "fc1_w_t": stack("fc1_w", lambda a: a.T.astype(jnp.bfloat16)),    # (D, H)
        "fc1_b": stack("fc1_b", lambda a: a.reshape(1, -1)),
        "fc2_w_t": stack("fc2_w", lambda a: a.T.astype(jnp.bfloat16)),    # (H, D)
        "fc2_b": stack("fc2_b", lambda a: a.reshape(1, -1)),
    }
    return {
        "patch_w_t": params["patch_w"].T.astype(jnp.bfloat16),           # (K, D)
        "patch_b": params["patch_b"].reshape(1, -1).astype(jnp.float32),
        "cls_token": params["cls_token"],
        "head_w_t": head_w_t,
        "head_b_pad": head_b,
        "n_classes": n_classes,
        "depth": depth,
        "blocks": blocks,
    }


def extract_patches(x, patch_size):
    """NCHW -> (B, n_patches, C*p*p); matches Conv2d(k=p, stride=p) + flatten."""
    B, C, H, W = x.shape
    p = patch_size
    gh, gw = H // p, W // p
    x = x.reshape(B, C, gh, p, gw, p)
    x = x.transpose(0, 2, 4, 1, 3, 5)                 # (B, gh, gw, C, p, p)
    return x.reshape(B, gh * gw, C * p * p)


def vit_forward(x, kp, *, patch_size, n_heads):
    B = x.shape[0]
    patches = extract_patches(x, patch_size)          # (B, P, K) f32
    _, P, K = patches.shape
    D = kp["patch_w_t"].shape[1]

    # patch embedding (conv as matmul), row-tiled at 256 rows per grid step
    emb = linear(patches.reshape(B * P, K), kp["patch_w_t"], kp["patch_b"])
    emb = emb.reshape(B, P, D)

    cls = jnp.broadcast_to(kp["cls_token"], (B, 1, D))
    h = jnp.concatenate([cls, emb], axis=1)           # (B, 1+P, D)
    # pos_drop(p=0.0) is identity; pos_emb is NOT added by the reference forward.

    n_real = P + 1
    n_pad = _round_up(n_real, 16)                     # bf16 sublane-packed tokens
    if n_pad != n_real:
        h = jnp.pad(h, ((0, 0), (0, n_pad - n_real), (0, 0)))

    h = run_blocks(h, kp["blocks"], n_heads=n_heads, n_real=n_real,
                   depth=kp["depth"])

    cls_final = h[:, 0]                               # (B, D)
    logits = linear(cls_final, kp["head_w_t"], kp["head_b_pad"])
    return logits[:, :kp["n_classes"]]


# ----------------------------------------------------------------------------
# Pure-JAX f32 reference (same math, torch-layout params) for a sanity check
# ----------------------------------------------------------------------------

def reference_forward(x, params, *, patch_size, n_heads):
    patches = extract_patches(x, patch_size)
    B, P, K = patches.shape
    D = params["patch_w"].shape[0]
    hd = D // n_heads
    emb = patches @ params["patch_w"].T + params["patch_b"]
    cls = jnp.broadcast_to(params["cls_token"], (B, 1, D))
    h = jnp.concatenate([cls, emb], axis=1)

    def ln(v, w, b):
        mu = v.mean(-1, keepdims=True)
        var = ((v - mu) ** 2).mean(-1, keepdims=True)
        return (v - mu) / jnp.sqrt(var + 1e-6) * w + b

    for bp in params["blocks"]:
        t = ln(h, bp["ln1_w"], bp["ln1_b"])
        qkv = t @ bp["qkv_w"].T + bp["qkv_b"]
        q, k, v = jnp.split(qkv, 3, axis=-1)
        sh = lambda a: a.reshape(B, -1, n_heads, hd).transpose(0, 2, 1, 3)
        qh, kh, vh = sh(q), sh(k), sh(v)
        s = jnp.einsum("bhqd,bhkd->bhqk", qh, kh) * hd ** -0.5
        p = jax.nn.softmax(s, axis=-1)
        o = jnp.einsum("bhqk,bhkd->bhqd", p, vh).transpose(0, 2, 1, 3).reshape(B, -1, D)
        h = h + o @ bp["proj_w"].T + bp["proj_b"]
        t = ln(h, bp["ln2_w"], bp["ln2_b"])
        t = jax.nn.gelu(t @ bp["fc1_w"].T + bp["fc1_b"], approximate=False)
        h = h + t @ bp["fc2_w"].T + bp["fc2_b"]

    return h[:, 0] @ params["head_w"].T + params["head_b"]


# ----------------------------------------------------------------------------

if __name__ == "__main__":
    # small, forward-consistent shapes
    IMG, PATCH, CIN, NCLS = 16, 4, 3, 10
    DIM, DEPTH, HEADS, MLP_RATIO = 32, 2, 4, 4.0
    BATCH = 2

    key = jax.random.PRNGKey(0)
    kx, kparam = jax.random.split(key)
    x = jax.random.normal(kx, (BATCH, CIN, IMG, IMG), jnp.float32)  # NCHW
    params = init_params(kparam, img_size=IMG, patch_size=PATCH, in_chans=CIN,
                         n_classes=NCLS, embed_dim=DIM, depth=DEPTH,
                         mlp_ratio=MLP_RATIO)
    kparams = prepare_kernel_params(params)

    logits = vit_forward(x, kparams, patch_size=PATCH, n_heads=HEADS)
    logits = jax.block_until_ready(logits)

    ref = reference_forward(x, params, patch_size=PATCH, n_heads=HEADS)
    assert logits.shape == (BATCH, NCLS), logits.shape
    # bf16 MXU inputs vs the all-f32 reference -> allow ~1e-2 level drift.
    assert jnp.allclose(logits, ref, atol=2e-2, rtol=2e-2), "mismatch vs reference"

    print("KERNEL_OK")
</pallas_src>

<mosaic_0001>
module attributes {stable_mosaic.version = 11 : i64} {
  func.func @linear_kernel(%arg0: i32, %arg1: memref<32x48xf32, #tpu.memory_space<vmem>>, %arg2: memref<48x32xbf16, #tpu.memory_space<vmem>>, %arg3: memref<1x32xf32, #tpu.memory_space<vmem>>, %arg4: memref<32x32xf32, #tpu.memory_space<vmem>>) attributes {dimension_semantics = [#tpu.dimension_semantics<parallel>], iteration_bounds = array<i64: 1>, scalar_prefetch = 0 : i64, scratch_operands = 0 : i64, tpu.core_type = #tpu.core_type<tc>, window_params = [{transform_indices = @transform_0, window_bounds = array<i64: 32, 48>}, {pipeline_mode = #tpu.pipeline_mode<synchronous>, transform_indices = @transform_1, window_bounds = array<i64: 48, 32>}, {pipeline_mode = #tpu.pipeline_mode<synchronous>, transform_indices = @transform_2, window_bounds = array<i64: 1, 32>}, {transform_indices = @transform_3, window_bounds = array<i64: 32, 32>}]} {
    %c0 = arith.constant 0 : index
    %c0_0 = arith.constant 0 : index
    %0 = vector.load %arg1[%c0, %c0_0] : memref<32x48xf32, #tpu.memory_space<vmem>>, vector<32x48xf32>
    %1 = arith.truncf %0 : vector<32x48xf32> to vector<32x48xbf16>
    %c0_1 = arith.constant 0 : index
    %c0_2 = arith.constant 0 : index
    %2 = vector.load %arg2[%c0_1, %c0_2] : memref<48x32xbf16, #tpu.memory_space<vmem>>, vector<48x32xbf16>
    %cst = arith.constant dense<0.000000e+00> : vector<32x32xf32>
    %3 = tpu.matmul %1, %2, %cst {dimension_numbers = #tpu.dot_dimension_numbers<[1], [0], [0], [1], [0, 0, 1, 1], [], []>} : vector<32x48xbf16>, vector<48x32xbf16>, vector<32x32xf32> -> vector<32x32xf32>
    %c0_3 = arith.constant 0 : index
    %c0_4 = arith.constant 0 : index
    %4 = vector.load %arg3[%c0_3, %c0_4] : memref<1x32xf32, #tpu.memory_space<vmem>>, vector<1x32xf32>
    %5 = vector.shape_cast %4 : vector<1x32xf32> to vector<32xf32>
    %6 = vector.shape_cast %5 : vector<32xf32> to vector<1x32xf32>
    %7 = vector.broadcast %6 : vector<1x32xf32> to vector<32x32xf32>
    %8 = arith.addf %3, %7 : vector<32x32xf32>
    %c0_5 = arith.constant 0 : index
    %c0_6 = arith.constant 0 : index
    %9 = vector.load %arg4[%c0_5, %c0_6] : memref<32x32xf32, #tpu.memory_space<vmem>>, vector<32x32xf32>
    tpu.vector_store %arg4[%c0_5, %c0_6], %8 {strides = array<i32>} : memref<32x32xf32, #tpu.memory_space<vmem>>, vector<32x32xf32>,
    return
  }
  func.func @transform_0(%arg0: i32) -> (i32, i32) {
    %c0_i32 = arith.constant 0 : i32
    %c0_i32_0 = arith.constant 0 : i32
    return %arg0, %c0_i32 : i32, i32
  }
  func.func @transform_1(%arg0: i32) -> (i32, i32) {
    %c0_i32 = arith.constant 0 : i32
    %c0_i32_0 = arith.constant 0 : i32
    %c0_i32_1 = arith.constant 0 : i32
    return %c0_i32, %c0_i32_0 : i32, i32
  }
  func.func @transform_2(%arg0: i32) -> (i32, i32) {
    %c0_i32 = arith.constant 0 : i32
    %c0_i32_0 = arith.constant 0 : i32
    %c0_i32_1 = arith.constant 0 : i32
    return %c0_i32, %c0_i32_0 : i32, i32
  }
  func.func @transform_3(%arg0: i32) -> (i32, i32) {
    %c0_i32 = arith.constant 0 : i32
    %c0_i32_0 = arith.constant 0 : i32
    return %arg0, %c0_i32 : i32, i32
  }
}

</mosaic_0001>

<bundles_post_ra>
// kernel: tpu_custom_call.1
= control target key start
LH: loop header
LB: loop body
LE: loop exit
PB: predicated region body
PF: predicated region fallthrough
CT: control target
= control target key end

     0   :  { %vm53_vm0 = vcmask 392192   ;;  %s240_s0 = inlined_call_operand.vmem [shape: f32[32,48], index: 0, kind: input, shape index: {}]   ;;  %s241_s1 = inlined_call_operand.vmem [shape: bf16[48,32], index: 1, kind: input, shape index: {}]   ;;  %s242_s2 = inlined_call_operand.vmem [shape: f32[1,32], index: 2, kind: input, shape index: {}]   ;;  %s243_s3 = inlined_call_operand.hbm [shape: f32[32,32], index: 3, kind: output, shape index: {}]  }
   0x1   :  { %v154_v0 = vld [vmem:[%s241_s1] sm:$0xff]   ;;  %v155_v1 = vld [vmem:[%s241_s1 + $0x8] sm:$0xff]   ;;  %v156_v4 = vld [vmem:[%s241_s1 + $0x10] sm:$0xff]  }
   0x2   :  { %141 = vmatprep.subr.bf16.mxu0 %v154_v0  ;;  %v16_v2 = vld [vmem:[%s240_s0] sm:$0xff]  ;;  %v17_v3 = vld [vmem:[%s240_s0 + $0x8] sm:$0xff] }
   0x3   :  { %142 = vmatpush3.bf16.msra.mxu0 %v154_v0  ;;  %v20_v5 = vpack.c.bf16 %v17_v3, %v16_v2 }
   0x4   :  { %143 = vmatprep.subr.bf16.mxu0 %v155_v1 }
   0x5   :  { %8 = vsyncpa [#allocation3], 0  ;;  %147 = vmatprep.mubr.msk.bf16.mxu0 %vm53_vm0, %v20_v5  ;;  %v18_v6 = vld [vmem:[%s240_s0 + $0x10] sm:$0xff]  ;;  %v19_v7 = vld [vmem:[%s240_s0 + $0x18] sm:$0xff]  ;;  %vm109_vm1 = vcmask 261120   ;;  %s181_s1 = smov [#allocation2]  }
   0x6   :  { %v21_v8 = vpack.c.bf16 %v19_v7, %v18_v6  ;;  %v130_v9 = vld [vmem:[%s242_s2] ss:$0 sm:$0xff]  ;;  %s119_s28 = sshll.u32 %s181_s1, 4  ;;  %s120_s28 = int_to_ptr.vmem [resolvable:$true] %s119_s28 }
   0x7   :  { %144 = vmatpush3.bf16.msra.mxu0 %v155_v1  ;;  %s157_s0 = scalar_lea.vmem %s120_s28, 512  ;;  %p162_p1 = scmp.lt.s32.totalorder %s120_s28, %s120_s28 }
   0x8   :  { %145 = vmatprep.subr.bf16.mxu0 %v156_v4  ;;  %p158_p0 = scmp.ne.s32.totalorder %s120_s28, %s157_s0  ;;  %p163_p2 = scmp.lt.s32.totalorder %s157_s0, %s157_s0 }
   0xa   :  { %p164_p3 = por %p163_p2, %p162_p1 }
   0xb   :  { %146 = vmatpush3.bf16.msra.mxu0 %v156_v4 }
   0xc   :  { %p165_p4 = pnand %p164_p3, %p158_p0 }
   0xe   :  { %148 = vmatmul.mubr.msk.bf16.vlgmr.msra.gmra.mrb[0].mxu0 %vm53_vm0, %v21_v8 }
  0xe1   :  { %v149_v10 = vpop.f32.mrb[0].mxu0 }
  0xe2   :  { %v103_v11 = vadd.f32 %v149_v10, %v130_v9  ;;  %v94_v12 = vpop.f32.mrb[1].mxu0 }
  0xe3   :  { %v95_v13 = vadd.f32 %v130_v9, %v94_v12  ;;  %v150_v14 = vpop.f32.mrb[2].mxu0 }
  0xe4   :  { %112 = vst.msk [vmem:[#allocation2 + $0x10] sm:$0xff] %vm109_vm1, %v103_v11  ;;  %v106_v15 = vadd.f32 %v150_v14, %v130_v9  ;;  %v97_v16 = vpop.f32.mrb[3].mxu0 }
  0xe5   :  { %110 = vst.msk [vmem:[#allocation2] sm:$0xff] %vm109_vm1, %v95_v13  ;;  %v98_v17 = vadd.f32 %v130_v9, %v97_v16 }
  0xe6   :  { %113 = vst.msk [vmem:[#allocation2 + $0x18] sm:$0xff] %vm109_vm1, %v106_v15 }
  0xe7   :  { %111 = vst.msk [vmem:[#allocation2 + $0x8] sm:$0xff] %vm109_vm1, %v98_v17 }
  0xe8   :  { %168 = shalt.err (!%p165_p4)
}
  0xe9   :  { %s169_s30 = scalar_lea.hbm %s243_s3, 512 }
  0xea   :  { %p170_p5 = scmp.ne.s32.totalorder %s243_s3, %s169_s30  ;;  %p173_p6 = scmp.lt.u32.totalorder %s169_s30, %s243_s3 }
  0xec   :  { %p175_p7 = pnand %p173_p6, %p170_p5 }
  0xee   :  { %178 = shalt.err (!%p175_p7)
}
  0xef   :  { %s182_s8 = smov 128   ;;  %s183_s9 = smov 8  }
  0xf0   :  { %125 = dma.vmem_to_hbm [thread:$0]  %s120_s28, 512, %s243_s3, [#allocation3], %s182_s8, %s182_s8, %s183_s9  }
  0xf1   :  { %179 = dma.done.wait [#allocation3], 512  }
  0xf2   :  { %180 = vsyncadd [#allocation3], 4294966784 }
  0xf3   :  { %129 = vsyncpa [#allocation3], 1 }

</bundles_post_ra>
